<compile_context>
chip_gen: v6e
topology: v6e:2x2x1
jax: 0.10.0
libtpu: 0.0.40
codegen_flags: <defaults>
</compile_context>

<pallas_src>
import jax
import jax.numpy as jnp
from jax.experimental import pallas as pl
from jax.experimental.pallas import tpu as pltpu

BN_EPS = 1e-5


def _encoder_kernel(x_ref, w1_ref, w2_ref, w3_ref, w4_ref, gb_ref, o_ref):
    """Fused 4x [bf16 MXU matmul -> folded BatchNorm(batch stats) -> sigmoid].

    x_ref  : (B, n_in) bf16 flattened input.
    w*_ref : (in, out) bf16 pre-transposed weights.  The Linear bias is omitted
             on purpose: training-mode BN subtracts the batch mean, so it
             cancels exactly.
    gb_ref : (2, n1+n2+n3+n4) f32; row 0 = gamma, row 1 = beta, per-layer blocks
             lane-concatenated so all BN params arrive in one DMA.
    """
    widths = (w1_ref.shape[1], w2_ref.shape[1], w3_ref.shape[1], w4_ref.shape[1])
    offs = (0,
            widths[0],
            widths[0] + widths[1],
            widths[0] + widths[1] + widths[2])
    inv_b = 1.0 / x_ref.shape[0]

    def layer(h_bf16, w_ref, li):
        # MXU: bf16 operands, f32 accumulation.
        z = jnp.dot(h_bf16, w_ref[...], preferred_element_type=jnp.float32)
        # BatchNorm1d (training mode, biased batch stats), one pass over z.
        s = jnp.sum(z, axis=0, keepdims=True)
        ss = jnp.sum(z * z, axis=0, keepdims=True)
        mean = s * inv_b
        var = jnp.maximum(ss * inv_b - mean * mean, 0.0)
        # Static lane slices of the packed gamma/beta buffer (zero-cost views).
        off, n = offs[li], widths[li]
        gamma = gb_ref[0:1, off:off + n]                  # (1, out)
        beta = gb_ref[1:2, off:off + n]                   # (1, out)
        scale = gamma * jax.lax.rsqrt(var + BN_EPS)       # fold BN -> mul+add
        shift = beta - mean * scale
        zn = z * scale + shift
        # Sigmoid: exp on the EUP, approx reciprocal also on the EUP slot.
        return pl.reciprocal(1.0 + jnp.exp(-zn), approx=True)

    h = x_ref[...]                                        # bf16
    h = layer(h, w1_ref, 0).astype(jnp.bfloat16)          # bf16 across boundaries
    h = layer(h, w2_ref, 1).astype(jnp.bfloat16)
    h = layer(h, w3_ref, 2).astype(jnp.bfloat16)
    o_ref[...] = layer(h, w4_ref, 3)                      # final output kept f32


def prepare_params(params):
    """One-time host-side prep (do NOT call per forward pass).

    params: list of 4 tuples (W(out,in), b(out,), gamma(out,), beta(out,)).
    Returns (wts, gb):
      wts : tuple of 4 pre-transposed (in, out) bf16 weight matrices.
      gb  : (2, sum(out)) f32; row 0 = gammas, row 1 = betas, lane-concatenated.
    NOTE: the Linear bias is dropped here.  That is exact ONLY under
    training-mode BatchNorm (batch-mean subtraction); do not reuse this prep
    with eval-mode BN (running stats) or without BN.
    """
    wts = tuple(jnp.asarray(w, jnp.float32).T.astype(jnp.bfloat16)
                for (w, _b, _g, _be) in params)
    gammas = jnp.concatenate([jnp.asarray(g, jnp.float32)
                              for (_w, _b, g, _be) in params])
    betas = jnp.concatenate([jnp.asarray(be, jnp.float32)
                             for (_w, _b, _g, be) in params])
    gb = jnp.stack([gammas, betas], axis=0)
    return wts, gb


@jax.jit
def encoder_forward(x_nchw, wts, gb):
    """x_nchw: (B, C, H, W). wts/gb: output of prepare_params()."""
    B = x_nchw.shape[0]
    x = x_nchw.reshape(B, -1).astype(jnp.bfloat16)        # nn.Flatten + bf16 once
    n_out = wts[-1].shape[1]

    vmem = pl.BlockSpec(memory_space=pltpu.MemorySpace.VMEM)
    return pl.pallas_call(
        _encoder_kernel,
        out_shape=jax.ShapeDtypeStruct((B, n_out), jnp.float32),
        in_specs=[vmem] * (1 + len(wts) + 1),
        out_specs=vmem,
        compiler_params=pltpu.CompilerParams(vmem_limit_bytes=4 * 1024 * 1024),
    )(x, *wts, gb)


def encoder_reference(x_nchw, params, matmul_dtype=jnp.float32):
    """Pure-JAX reference with the torch module's training-mode semantics
    (bias kept, BN unfolded, two-pass variance, exact sigmoid).
    matmul_dtype=bfloat16 mimics the kernel's MXU operand precision."""
    h = x_nchw.reshape(x_nchw.shape[0], -1).astype(jnp.float32)
    for (w, b, g, be) in params:
        z = jnp.dot(h.astype(matmul_dtype),
                    jnp.asarray(w, jnp.float32).T.astype(matmul_dtype),
                    preferred_element_type=jnp.float32) + b
        mean = z.mean(0, keepdims=True)
        var = ((z - mean) ** 2).mean(0, keepdims=True)
        zn = (z - mean) / jnp.sqrt(var + BN_EPS) * g + be
        h = 1.0 / (1.0 + jnp.exp(-zn))
    return h


def init_params(key, dims):
    """Deterministic init mimicking torch.nn.Linear (uniform +-1/sqrt(fan_in));
    BatchNorm affine params start as ones/zeros."""
    params = []
    for n_in, n_out in zip(dims[:-1], dims[1:]):
        key, kw, kb = jax.random.split(key, 3)
        bound = 1.0 / jnp.sqrt(float(n_in))
        w = jax.random.uniform(kw, (n_out, n_in), jnp.float32, -bound, bound)
        b = jax.random.uniform(kb, (n_out,), jnp.float32, -bound, bound)
        g = jnp.ones((n_out,), jnp.float32)
        be = jnp.zeros((n_out,), jnp.float32)
        params.append((w, b, g, be))
    return params


if __name__ == "__main__":
    # Small shapes consistent with the module: x is NCHW (2, 4, 16, 16) -> n_in = 1024.
    B, C, H, W = 2, 4, 16, 16
    n_in = C * H * W
    dims = [n_in, 256, 128, 128, 64]   # n_in, n_hidden1, n_hidden2, n_hidden3, n_out

    key = jax.random.PRNGKey(0)
    kx, kp = jax.random.split(key)
    x = jax.random.normal(kx, (B, C, H, W), jnp.float32)
    params = init_params(kp, dims)
    wts, gb = prepare_params(params)   # one-time: transpose + bf16 + pack gamma/beta

    out = jax.block_until_ready(encoder_forward(x, wts, gb))

    # Reference with matched MXU operand precision (bf16 operands, f32 accumulate).
    ref = jax.block_until_ready(encoder_reference(x, params, jnp.bfloat16))
    assert out.shape == (B, dims[-1])
    # With B=2, BN normalizes each feature's two rows to ~+-1, which can amplify
    # tiny rounding differences (bias-drop / BN-fold / one-pass variance /
    # approx reciprocal), hence a relaxed-but-meaningful tolerance.
    assert jnp.allclose(out, ref, atol=1e-2, rtol=1e-2), "mismatch vs reference"

    print("KERNEL_OK")
</pallas_src>

<mosaic_0001>
module attributes {stable_mosaic.version = 11 : i64} {
  func.func @_encoder_kernel(%arg0: memref<2x1024xbf16, #tpu.memory_space<vmem>>, %arg1: memref<1024x256xbf16, #tpu.memory_space<vmem>>, %arg2: memref<256x128xbf16, #tpu.memory_space<vmem>>, %arg3: memref<128x128xbf16, #tpu.memory_space<vmem>>, %arg4: memref<128x64xbf16, #tpu.memory_space<vmem>>, %arg5: memref<2x576xf32, #tpu.memory_space<vmem>>, %arg6: memref<2x64xf32, #tpu.memory_space<vmem>>) attributes {dimension_semantics = [], scalar_prefetch = 0 : i64, scratch_operands = 0 : i64, tpu.core_type = #tpu.core_type<tc>} {
    %c0 = arith.constant 0 : index
    %c0_0 = arith.constant 0 : index
    %0 = vector.load %arg0[%c0, %c0_0] : memref<2x1024xbf16, #tpu.memory_space<vmem>>, vector<2x1024xbf16>
    %c0_1 = arith.constant 0 : index
    %c0_2 = arith.constant 0 : index
    %1 = vector.load %arg1[%c0_1, %c0_2] : memref<1024x256xbf16, #tpu.memory_space<vmem>>, vector<1024x256xbf16>
    %cst = arith.constant dense<0.000000e+00> : vector<2x256xf32>
    %2 = tpu.matmul %0, %1, %cst {dimension_numbers = #tpu.dot_dimension_numbers<[1], [0], [0], [1], [0, 0, 1, 1], [], []>} : vector<2x1024xbf16>, vector<1024x256xbf16>, vector<2x256xf32> -> vector<2x256xf32>
    %cst_3 = arith.constant dense<0.000000e+00> : vector<256xf32>
    %3 = vector.multi_reduction <add>, %2, %cst_3 [0] : vector<2x256xf32> to vector<256xf32>
    %4 = vector.shape_cast %3 : vector<256xf32> to vector<1x256xf32>
    %5 = arith.mulf %2, %2 : vector<2x256xf32>
    %cst_4 = arith.constant dense<0.000000e+00> : vector<256xf32>
    %6 = vector.multi_reduction <add>, %5, %cst_4 [0] : vector<2x256xf32> to vector<256xf32>
    %7 = vector.shape_cast %6 : vector<256xf32> to vector<1x256xf32>
    %cst_5 = arith.constant 5.000000e-01 : f32
    %8 = vector.broadcast %cst_5 : f32 to vector<1x256xf32>
    %9 = arith.mulf %4, %8 : vector<1x256xf32>
    %cst_6 = arith.constant 5.000000e-01 : f32
    %10 = vector.broadcast %cst_6 : f32 to vector<1x256xf32>
    %11 = arith.mulf %7, %10 : vector<1x256xf32>
    %12 = arith.mulf %9, %9 : vector<1x256xf32>
    %13 = arith.subf %11, %12 : vector<1x256xf32>
    %cst_7 = arith.constant 0.000000e+00 : f32
    %14 = vector.broadcast %cst_7 : f32 to vector<1x256xf32>
    %15 = arith.maximumf %13, %14 : vector<1x256xf32>
    %c0_8 = arith.constant 0 : index
    %c0_9 = arith.constant 0 : index
    %16 = vector.load %arg5[%c0_8, %c0_9] : memref<2x576xf32, #tpu.memory_space<vmem>>, vector<1x256xf32>
    %c1 = arith.constant 1 : index
    %c0_10 = arith.constant 0 : index
    %17 = vector.load %arg5[%c1, %c0_10] : memref<2x576xf32, #tpu.memory_space<vmem>>, vector<1x256xf32>
    %cst_11 = arith.constant 9.99999974E-6 : f32
    %18 = vector.broadcast %cst_11 : f32 to vector<1x256xf32>
    %19 = arith.addf %15, %18 : vector<1x256xf32>
    %20 = math.rsqrt %19 : vector<1x256xf32>
    %21 = arith.mulf %16, %20 : vector<1x256xf32>
    %22 = arith.mulf %9, %21 : vector<1x256xf32>
    %23 = arith.subf %17, %22 : vector<1x256xf32>
    %24 = vector.broadcast %21 : vector<1x256xf32> to vector<2x256xf32>
    %25 = arith.mulf %2, %24 : vector<2x256xf32>
    %26 = vector.broadcast %23 : vector<1x256xf32> to vector<2x256xf32>
    %27 = arith.addf %25, %26 : vector<2x256xf32>
    %cst_12 = arith.constant 0.000000e+00 : f32
    %28 = vector.broadcast %cst_12 : f32 to vector<2x256xf32>
    %29 = arith.subf %28, %27 : vector<2x256xf32>
    %30 = math.exp %29 : vector<2x256xf32>
    %cst_13 = arith.constant 1.000000e+00 : f32
    %31 = vector.broadcast %cst_13 : f32 to vector<2x256xf32>
    %32 = arith.addf %31, %30 : vector<2x256xf32>
    %33 = tpu.reciprocal %32 {approx = true} : vector<2x256xf32> -> vector<2x256xf32>
    %34 = arith.truncf %33 : vector<2x256xf32> to vector<2x256xbf16>
    %c0_14 = arith.constant 0 : index
    %c0_15 = arith.constant 0 : index
    %35 = vector.load %arg2[%c0_14, %c0_15] : memref<256x128xbf16, #tpu.memory_space<vmem>>, vector<256x128xbf16>
    %cst_16 = arith.constant dense<0.000000e+00> : vector<2x128xf32>
    %36 = tpu.matmul %34, %35, %cst_16 {dimension_numbers = #tpu.dot_dimension_numbers<[1], [0], [0], [1], [0, 0, 1, 1], [], []>} : vector<2x256xbf16>, vector<256x128xbf16>, vector<2x128xf32> -> vector<2x128xf32>
    %cst_17 = arith.constant dense<0.000000e+00> : vector<128xf32>
    %37 = vector.multi_reduction <add>, %36, %cst_17 [0] : vector<2x128xf32> to vector<128xf32>
    %38 = vector.shape_cast %37 : vector<128xf32> to vector<1x128xf32>
    %39 = arith.mulf %36, %36 : vector<2x128xf32>
    %cst_18 = arith.constant dense<0.000000e+00> : vector<128xf32>
    %40 = vector.multi_reduction <add>, %39, %cst_18 [0] : vector<2x128xf32> to vector<128xf32>
    %41 = vector.shape_cast %40 : vector<128xf32> to vector<1x128xf32>
    %cst_19 = arith.constant 5.000000e-01 : f32
    %42 = vector.broadcast %cst_19 : f32 to vector<1x128xf32>
    %43 = arith.mulf %38, %42 : vector<1x128xf32>
    %cst_20 = arith.constant 5.000000e-01 : f32
    %44 = vector.broadcast %cst_20 : f32 to vector<1x128xf32>
    %45 = arith.mulf %41, %44 : vector<1x128xf32>
    %46 = arith.mulf %43, %43 : vector<1x128xf32>
    %47 = arith.subf %45, %46 : vector<1x128xf32>
    %cst_21 = arith.constant 0.000000e+00 : f32
    %48 = vector.broadcast %cst_21 : f32 to vector<1x128xf32>
    %49 = arith.maximumf %47, %48 : vector<1x128xf32>
    %c0_22 = arith.constant 0 : index
    %c256 = arith.constant 256 : index
    %50 = vector.load %arg5[%c0_22, %c256] : memref<2x576xf32, #tpu.memory_space<vmem>>, vector<1x128xf32>
    %c1_23 = arith.constant 1 : index
    %c256_24 = arith.constant 256 : index
    %51 = vector.load %arg5[%c1_23, %c256_24] : memref<2x576xf32, #tpu.memory_space<vmem>>, vector<1x128xf32>
    %cst_25 = arith.constant 9.99999974E-6 : f32
    %52 = vector.broadcast %cst_25 : f32 to vector<1x128xf32>
    %53 = arith.addf %49, %52 : vector<1x128xf32>
    %54 = math.rsqrt %53 : vector<1x128xf32>
    %55 = arith.mulf %50, %54 : vector<1x128xf32>
    %56 = arith.mulf %43, %55 : vector<1x128xf32>
    %57 = arith.subf %51, %56 : vector<1x128xf32>
    %58 = vector.broadcast %55 : vector<1x128xf32> to vector<2x128xf32>
    %59 = arith.mulf %36, %58 : vector<2x128xf32>
    %60 = vector.broadcast %57 : vector<1x128xf32> to vector<2x128xf32>
    %61 = arith.addf %59, %60 : vector<2x128xf32>
    %cst_26 = arith.constant 0.000000e+00 : f32
    %62 = vector.broadcast %cst_26 : f32 to vector<2x128xf32>
    %63 = arith.subf %62, %61 : vector<2x128xf32>
    %64 = math.exp %63 : vector<2x128xf32>
    %cst_27 = arith.constant 1.000000e+00 : f32
    %65 = vector.broadcast %cst_27 : f32 to vector<2x128xf32>
    %66 = arith.addf %65, %64 : vector<2x128xf32>
    %67 = tpu.reciprocal %66 {approx = true} : vector<2x128xf32> -> vector<2x128xf32>
    %68 = arith.truncf %67 : vector<2x128xf32> to vector<2x128xbf16>
    %c0_28 = arith.constant 0 : index
    %c0_29 = arith.constant 0 : index
    %69 = vector.load %arg3[%c0_28, %c0_29] : memref<128x128xbf16, #tpu.memory_space<vmem>>, vector<128x128xbf16>
    %cst_30 = arith.constant dense<0.000000e+00> : vector<2x128xf32>
    %70 = tpu.matmul %68, %69, %cst_30 {dimension_numbers = #tpu.dot_dimension_numbers<[1], [0], [0], [1], [0, 0, 1, 1], [], []>} : vector<2x128xbf16>, vector<128x128xbf16>, vector<2x128xf32> -> vector<2x128xf32>
    %cst_31 = arith.constant dense<0.000000e+00> : vector<128xf32>
    %71 = vector.multi_reduction <add>, %70, %cst_31 [0] : vector<2x128xf32> to vector<128xf32>
    %72 = vector.shape_cast %71 : vector<128xf32> to vector<1x128xf32>
    %73 = arith.mulf %70, %70 : vector<2x128xf32>
    %cst_32 = arith.constant dense<0.000000e+00> : vector<128xf32>
    %74 = vector.multi_reduction <add>, %73, %cst_32 [0] : vector<2x128xf32> to vector<128xf32>
    %75 = vector.shape_cast %74 : vector<128xf32> to vector<1x128xf32>
    %cst_33 = arith.constant 5.000000e-01 : f32
    %76 = vector.broadcast %cst_33 : f32 to vector<1x128xf32>
    %77 = arith.mulf %72, %76 : vector<1x128xf32>
    %cst_34 = arith.constant 5.000000e-01 : f32
    %78 = vector.broadcast %cst_34 : f32 to vector<1x128xf32>
    %79 = arith.mulf %75, %78 : vector<1x128xf32>
    %80 = arith.mulf %77, %77 : vector<1x128xf32>
    %81 = arith.subf %79, %80 : vector<1x128xf32>
    %cst_35 = arith.constant 0.000000e+00 : f32
    %82 = vector.broadcast %cst_35 : f32 to vector<1x128xf32>
    %83 = arith.maximumf %81, %82 : vector<1x128xf32>
    %c0_36 = arith.constant 0 : index
    %c384 = arith.constant 384 : index
    %84 = vector.load %arg5[%c0_36, %c384] : memref<2x576xf32, #tpu.memory_space<vmem>>, vector<1x128xf32>
    %c1_37 = arith.constant 1 : index
    %c384_38 = arith.constant 384 : index
    %85 = vector.load %arg5[%c1_37, %c384_38] : memref<2x576xf32, #tpu.memory_space<vmem>>, vector<1x128xf32>
    %cst_39 = arith.constant 9.99999974E-6 : f32
    %86 = vector.broadcast %cst_39 : f32 to vector<1x128xf32>
    %87 = arith.addf %83, %86 : vector<1x128xf32>
    %88 = math.rsqrt %87 : vector<1x128xf32>
    %89 = arith.mulf %84, %88 : vector<1x128xf32>
    %90 = arith.mulf %77, %89 : vector<1x128xf32>
    %91 = arith.subf %85, %90 : vector<1x128xf32>
    %92 = vector.broadcast %89 : vector<1x128xf32> to vector<2x128xf32>
    %93 = arith.mulf %70, %92 : vector<2x128xf32>
    %94 = vector.broadcast %91 : vector<1x128xf32> to vector<2x128xf32>
    %95 = arith.addf %93, %94 : vector<2x128xf32>
    %cst_40 = arith.constant 0.000000e+00 : f32
    %96 = vector.broadcast %cst_40 : f32 to vector<2x128xf32>
    %97 = arith.subf %96, %95 : vector<2x128xf32>
    %98 = math.exp %97 : vector<2x128xf32>
    %cst_41 = arith.constant 1.000000e+00 : f32
    %99 = vector.broadcast %cst_41 : f32 to vector<2x128xf32>
    %100 = arith.addf %99, %98 : vector<2x128xf32>
    %101 = tpu.reciprocal %100 {approx = true} : vector<2x128xf32> -> vector<2x128xf32>
    %102 = arith.truncf %101 : vector<2x128xf32> to vector<2x128xbf16>
    %c0_42 = arith.constant 0 : index
    %c0_43 = arith.constant 0 : index
    %103 = vector.load %arg4[%c0_42, %c0_43] : memref<128x64xbf16, #tpu.memory_space<vmem>>, vector<128x64xbf16>
    %cst_44 = arith.constant dense<0.000000e+00> : vector<2x64xf32>
    %104 = tpu.matmul %102, %103, %cst_44 {dimension_numbers = #tpu.dot_dimension_numbers<[1], [0], [0], [1], [0, 0, 1, 1], [], []>} : vector<2x128xbf16>, vector<128x64xbf16>, vector<2x64xf32> -> vector<2x64xf32>
    %cst_45 = arith.constant dense<0.000000e+00> : vector<64xf32>
    %105 = vector.multi_reduction <add>, %104, %cst_45 [0] : vector<2x64xf32> to vector<64xf32>
    %106 = vector.shape_cast %105 : vector<64xf32> to vector<1x64xf32>
    %107 = arith.mulf %104, %104 : vector<2x64xf32>
    %cst_46 = arith.constant dense<0.000000e+00> : vector<64xf32>
    %108 = vector.multi_reduction <add>, %107, %cst_46 [0] : vector<2x64xf32> to vector<64xf32>
    %109 = vector.shape_cast %108 : vector<64xf32> to vector<1x64xf32>
    %cst_47 = arith.constant 5.000000e-01 : f32
    %110 = vector.broadcast %cst_47 : f32 to vector<1x64xf32>
    %111 = arith.mulf %106, %110 : vector<1x64xf32>
    %cst_48 = arith.constant 5.000000e-01 : f32
    %112 = vector.broadcast %cst_48 : f32 to vector<1x64xf32>
    %113 = arith.mulf %109, %112 : vector<1x64xf32>
    %114 = arith.mulf %111, %111 : vector<1x64xf32>
    %115 = arith.subf %113, %114 : vector<1x64xf32>
    %cst_49 = arith.constant 0.000000e+00 : f32
    %116 = vector.broadcast %cst_49 : f32 to vector<1x64xf32>
    %117 = arith.maximumf %115, %116 : vector<1x64xf32>
    %c0_50 = arith.constant 0 : index
    %c512 = arith.constant 512 : index
    %118 = vector.load %arg5[%c0_50, %c512] : memref<2x576xf32, #tpu.memory_space<vmem>>, vector<1x64xf32>
    %c1_51 = arith.constant 1 : index
    %c512_52 = arith.constant 512 : index
    %119 = vector.load %arg5[%c1_51, %c512_52] : memref<2x576xf32, #tpu.memory_space<vmem>>, vector<1x64xf32>
    %cst_53 = arith.constant 9.99999974E-6 : f32
    %120 = vector.broadcast %cst_53 : f32 to vector<1x64xf32>
    %121 = arith.addf %117, %120 : vector<1x64xf32>
    %122 = math.rsqrt %121 : vector<1x64xf32>
    %123 = arith.mulf %118, %122 : vector<1x64xf32>
    %124 = arith.mulf %111, %123 : vector<1x64xf32>
    %125 = arith.subf %119, %124 : vector<1x64xf32>
    %126 = vector.broadcast %123 : vector<1x64xf32> to vector<2x64xf32>
    %127 = arith.mulf %104, %126 : vector<2x64xf32>
    %128 = vector.broadcast %125 : vector<1x64xf32> to vector<2x64xf32>
    %129 = arith.addf %127, %128 : vector<2x64xf32>
    %cst_54 = arith.constant 0.000000e+00 : f32
    %130 = vector.broadcast %cst_54 : f32 to vector<2x64xf32>
    %131 = arith.subf %130, %129 : vector<2x64xf32>
    %132 = math.exp %131 : vector<2x64xf32>
    %cst_55 = arith.constant 1.000000e+00 : f32
    %133 = vector.broadcast %cst_55 : f32 to vector<2x64xf32>
    %134 = arith.addf %133, %132 : vector<2x64xf32>
    %135 = tpu.reciprocal %134 {approx = true} : vector<2x64xf32> -> vector<2x64xf32>
    %c0_56 = arith.constant 0 : index
    %c0_57 = arith.constant 0 : index
    %136 = vector.load %arg6[%c0_56, %c0_57] : memref<2x64xf32, #tpu.memory_space<vmem>>, vector<2x64xf32>
    tpu.vector_store %arg6[%c0_56, %c0_57], %135 {strides = array<i32>} : memref<2x64xf32, #tpu.memory_space<vmem>>, vector<2x64xf32>,
    return
  }
}

</mosaic_0001>

<bundles_post_ra>
// kernel: encoder_forward.1
= control target key start
LH: loop header
LB: loop body
LE: loop exit
PB: predicated region body
PF: predicated region fallthrough
CT: control target
= control target key end

     0   :  { %11 = vsyncpa [#allocation3], 0  ;;  %s2468_s0 = inlined_call_operand.vmem [shape: bf16[2,1024], index: 0, kind: input, shape index: {}]   ;;  %s2469_s1 = inlined_call_operand.hbm [shape: bf16[1024,256], index: 1, kind: input, shape index: {}]   ;;  %s2470_s2 = inlined_call_operand.vmem [shape: bf16[256,128], index: 2, kind: input, shape index: {}]   ;;  %s2471_s3 = inlined_call_operand.vmem [shape: bf16[128,128], index: 3, kind: input, shape index: {}]   ;;  %s2472_s4 = inlined_call_operand.vmem [shape: bf16[128,64], index: 4, kind: input, shape index: {}]   ;;  %s2473_s5 = inlined_call_operand.vmem [shape: f32[2,576], index: 5, kind: input, shape index: {}]   ;;  %s2474_s6 = inlined_call_operand.hbm [shape: f32[2,64], index: 6, kind: output, shape index: {}]  }
   0x1   :  { %12 = vsyncpa [#allocation4], 0  ;;  %s2224_s21 = smov [#allocation2]  }
   0x2   :  { %s20_s22 = sshll.u32 %s2224_s21, 4  ;;  %s21_s22 = int_to_ptr.vmem [resolvable:$true] %s20_s22 }
   0x3   :  { %s2188_s23 = scalar_lea.vmem %s21_s22, 16384  ;;  %p2193_p1 = scmp.lt.s32.totalorder %s21_s22, %s21_s22 }
   0x4   :  { %p2189_p0 = scmp.ne.s32.totalorder %s21_s22, %s2188_s23  ;;  %p2194_p2 = scmp.lt.s32.totalorder %s2188_s23, %s2188_s23 }
   0x6   :  { %p2195_p3 = por %p2194_p2, %p2193_p1 }
   0x8   :  { %p2196_p4 = pnand %p2195_p3, %p2189_p0 }
   0xa   :  { %2199 = shalt.err (!%p2196_p4)
}
   0xb   :  { %s2225_s24 = smov 128   ;;  %s2226_s25 = smov 8  }
   0xc   :  { %26 = dma.hbm_to_vmem [thread:$0]  %s2469_s1, 16384, %s21_s22, [#allocation3], %s2225_s24, %s2225_s24, %s2226_s25  }
   0xd   :  { %2220 = dma.done.wait [#allocation3], 16384  }
   0xe   :  { %2221 = vsyncadd [#allocation3], 4294950912  ;;  %v1925_v0 = vld [vmem:[#allocation2 + $0x74] ss:$8 sps:$4 sm:$0xff]   ;;  %v1929_v2 = vld [vmem:[#allocation2 + $0x70] ss:$8 sps:$4 sm:$0xff]   ;;  %v173_v38 = vlaneseq }
   0xf   :  { %v1927_v1 = vld [vmem:[#allocation2 + $0x174] ss:$8 sps:$4 sm:$0xff]   ;;  %866 = vmatprep.subr.bf16.mxu0 %v1925_v0  ;;  %v1930_v3 = vld [vmem:[#allocation2 + $0x170] ss:$8 sps:$4 sm:$0xff]   ;;  %v1931_v4 = vld [vmem:[#allocation2 + $0x64] ss:$8 sps:$4 sm:$0xff]  }
  0x10   :  { %907 = vmatprep.subr.bf16.mxu1 %v1927_v1  ;;  %867 = vmatpush1.bf16.msra.mxu0 %v1929_v2  ;;  %v1933_v5 = vld [vmem:[#allocation2 + $0x164] ss:$8 sps:$4 sm:$0xff]   ;;  %v1935_v6 = vld [vmem:[#allocation2 + $0x60] ss:$8 sps:$4 sm:$0xff]   ;;  %v1937_v8 = vld [vmem:[#allocation2 + $0x54] ss:$8 sps:$4 sm:$0xff]  }
  0x11   :  { %908 = vmatpush1.bf16.msra.mxu1 %v1930_v3  ;;  %868 = vmatprep.subr.bf16.mxu0 %v1931_v4  ;;  %v1936_v7 = vld [vmem:[#allocation2 + $0x160] ss:$8 sps:$4 sm:$0xff]   ;;  %v1939_v9 = vld [vmem:[#allocation2 + $0x154] ss:$8 sps:$4 sm:$0xff]   ;;  %v1941_v10 = vld [vmem:[#allocation2 + $0x50] ss:$8 sps:$4 sm:$0xff]  }
  0x12   :  { %909 = vmatprep.subr.bf16.mxu1 %v1933_v5  ;;  %v1942_v11 = vld [vmem:[#allocation2 + $0x150] ss:$8 sps:$4 sm:$0xff]   ;;  %v1943_v12 = vld [vmem:[#allocation2 + $0x44] ss:$8 sps:$4 sm:$0xff]   ;;  %v1947_v14 = vld [vmem:[#allocation2 + $0x40] ss:$8 sps:$4 sm:$0xff]  }
  0x13   :  { %v1945_v13 = vld [vmem:[#allocation2 + $0x144] ss:$8 sps:$4 sm:$0xff]   ;;  %v1948_v15 = vld [vmem:[#allocation2 + $0x140] ss:$8 sps:$4 sm:$0xff]   ;;  %v1949_v16 = vld [vmem:[#allocation2 + $0x34] ss:$8 sps:$4 sm:$0xff]  }
  0x14   :  { %869 = vmatpush1.bf16.msra.mxu0 %v1935_v6  ;;  %v1951_v17 = vld [vmem:[#allocation2 + $0x134] ss:$8 sps:$4 sm:$0xff]   ;;  %v1953_v18 = vld [vmem:[#allocation2 + $0x30] ss:$8 sps:$4 sm:$0xff]   ;;  %v1955_v20 = vld [vmem:[#allocation2 + $0x24] ss:$8 sps:$4 sm:$0xff]  }
  0x15   :  { %910 = vmatpush1.bf16.msra.mxu1 %v1936_v7  ;;  %870 = vmatprep.subr.bf16.mxu0 %v1937_v8  ;;  %v1954_v19 = vld [vmem:[#allocation2 + $0x130] ss:$8 sps:$4 sm:$0xff]   ;;  %v1957_v21 = vld [vmem:[#allocation2 + $0x124] ss:$8 sps:$4 sm:$0xff]   ;;  %v1959_v22 = vld [vmem:[#allocation2 + $0x20] ss:$8 sps:$4 sm:$0xff]  }
  0x16   :  { %911 = vmatprep.subr.bf16.mxu1 %v1939_v9  ;;  %v1960_v23 = vld [vmem:[#allocation2 + $0x120] ss:$8 sps:$4 sm:$0xff]   ;;  %v1961_v24 = vld [vmem:[#allocation2 + $0x14] ss:$8 sps:$4 sm:$0xff]   ;;  %v1965_v26 = vld [vmem:[#allocation2 + $0x10] ss:$8 sps:$4 sm:$0xff]  }
  0x17   :  { %v1963_v25 = vld [vmem:[#allocation2 + $0x114] ss:$8 sps:$4 sm:$0xff]   ;;  %v1966_v27 = vld [vmem:[#allocation2 + $0x110] ss:$8 sps:$4 sm:$0xff]   ;;  %v1967_v28 = vld [vmem:[#allocation2 + $0x4] ss:$8 sps:$4 sm:$0xff]  }
  0x18   :  { %871 = vmatpush1.bf16.msra.mxu0 %v1941_v10  ;;  %v1969_v29 = vld [vmem:[#allocation2 + $0x104] ss:$8 sps:$4 sm:$0xff]   ;;  %v1971_v30 = vld [vmem:[#allocation2] ss:$8 sps:$4 sm:$0xff]   ;;  %v1973_v32 = vld [vmem:[#allocation2 + $0xf4] ss:$8 sps:$4 sm:$0xff]  }
  0x19   :  { %912 = vmatpush1.bf16.msra.mxu1 %v1942_v11  ;;  %872 = vmatprep.subr.bf16.mxu0 %v1943_v12  ;;  %v1972_v31 = vld [vmem:[#allocation2 + $0x100] ss:$8 sps:$4 sm:$0xff]   ;;  %v1975_v33 = vld [vmem:[#allocation2 + $0x1f4] ss:$8 sps:$4 sm:$0xff]   ;;  %v1977_v34 = vld [vmem:[#allocation2 + $0xf0] ss:$8 sps:$4 sm:$0xff]  }
  0x1a   :  { %913 = vmatprep.subr.bf16.mxu1 %v1945_v13  ;;  %v1978_v35 = vld [vmem:[#allocation2 + $0x1f0] ss:$8 sps:$4 sm:$0xff]   ;;  %v2227_v36 = vmov 1966171168   ;;  %v1979_v39 = vld [vmem:[#allocation2 + $0xe4] ss:$8 sps:$4 sm:$0xff]  }
  0x1b   :  { %v171_v37 = vunpack.c.l.s4 %v2227_v36  ;;  %v1981_v40 = vld [vmem:[#allocation2 + $0x1e4] ss:$8 sps:$4 sm:$0xff]   ;;  %v1983_v41 = vld [vmem:[#allocation2 + $0xe0] ss:$8 sps:$4 sm:$0xff]   ;;  %v2269_v43 = vshrl.u32 %v173_v38, 7  ;;  %vm1030_vm0 = vcmask 1041408  }
  0x1c   :  { %873 = vmatpush1.bf16.msra.mxu0 %v1947_v14  ;;  %v1984_v44 = vld [vmem:[#allocation2 + $0x1e0] ss:$8 sps:$4 sm:$0xff]   ;;  %v1985_v45 = vld [vmem:[#allocation2 + $0xd4] ss:$8 sps:$4 sm:$0xff]   ;;  %v1989_v47 = vld [vmem:[#allocation2 + $0xd0] ss:$8 sps:$4 sm:$0xff]  }
  0x1d   :  { %914 = vmatpush1.bf16.msra.mxu1 %v1948_v15  ;;  %874 = vmatprep.subr.bf16.mxu0 %v1949_v16  ;;  %v172_v42 = vunpack.c.0.s8 %v171_v37  ;;  %v1987_v46 = vld [vmem:[#allocation2 + $0x1d4] ss:$8 sps:$4 sm:$0xff]   ;;  %v1990_v48 = vld [vmem:[#allocation2 + $0x1d0] ss:$8 sps:$4 sm:$0xff]   ;;  %v1991_v50 = vld [vmem:[#allocation2 + $0xc4] ss:$8 sps:$4 sm:$0xff]  }
  0x1e   :  { %915 = vmatprep.subr.bf16.mxu1 %v1951_v17  ;;  %v1993_v51 = vld [vmem:[#allocation2 + $0x1c4] ss:$8 sps:$4 sm:$0xff]   ;;  %v1995_v53 = vld [vmem:[#allocation2 + $0xc0] ss:$8 sps:$4 sm:$0xff]   ;;  %v1997_v56 = vld [vmem:[#allocation2 + $0xb4] ss:$8 sps:$4 sm:$0xff]  }
  0x1f   :  { %v2272_v49 = vsub.s32 %v172_v42, %v2269_v43  ;;  %v39_v52 = vld [vmem:[%s2468_s0] sm:$0xff]  ;;  %v1999_v57 = vld [vmem:[#allocation2 + $0x1b4] ss:$8 sps:$4 sm:$0xff]   ;;  %v2001_v59 = vld [vmem:[#allocation2 + $0xb0] ss:$8 sps:$4 sm:$0xff]   ;;  %vm2229_vm1 = vmmov 0  }
  0x20   :  { %875 = vmatpush1.bf16.msra.mxu0 %v1953_v18  ;;  %v1996_v55 = vld [vmem:[#allocation2 + $0x1c0] ss:$8 sps:$4 sm:$0xff]   ;;  %v2002_v61 = vld [vmem:[#allocation2 + $0x1b0] ss:$8 sps:$4 sm:$0xff]   ;;  %v2003_v62 = vld [vmem:[#allocation2 + $0xa4] ss:$8 sps:$4 sm:$0xff]   ;;  %v169_v1 = vcombine.high %v39_v52, %v39_v52 }
  0x21   :  { %916 = vmatpush1.bf16.msra.mxu1 %v1954_v19  ;;  %876 = vmatprep.subr.bf16.mxu0 %v1955_v20  ;;  %v176_v54 = vrot.slane %v39_v52, %v2272_v49  ;;  %v2005_v63 = vld [vmem:[#allocation2 + $0x1a4] ss:$8 sps:$4 sm:$0xff]   ;;  %v2007_v2 = vld [vmem:[#allocation2 + $0xa0] ss:$8 sps:$4 sm:$0xff]   ;;  %v2009_v4 = vld [vmem:[#allocation2 + $0x94] ss:$8 sps:$4 sm:$0xff]  }
  0x22   :  { %917 = vmatprep.subr.bf16.mxu1 %v1957_v21  ;;  %v2008_v3 = vld [vmem:[#allocation2 + $0x1a0] ss:$8 sps:$4 sm:$0xff]   ;;  %v2011_v5 = vld [vmem:[#allocation2 + $0x194] ss:$8 sps:$4 sm:$0xff]   ;;  %v2280_v6 = vrot.slane %v169_v1, %v2272_v49  ;;  %v2013_v7 = vld [vmem:[#allocation2 + $0x90] ss:$8 sps:$4 sm:$0xff]  }
  0x23   :  { %v184_v58 = vcombine.high %v176_v54, %v176_v54  ;;  %v2014_v8 = vld [vmem:[#allocation2 + $0x190] ss:$8 sps:$4 sm:$0xff]   ;;  %v2015_v9 = vld [vmem:[#allocation2 + $0x84] ss:$8 sps:$4 sm:$0xff]   ;;  %v2019_v12 = vld [vmem:[#allocation2 + $0x80] ss:$8 sps:$4 sm:$0xff]   ;;  %v192_v13 = vrot.slane %v176_v54, %v2272_v49 }
  0x24   :  { %877 = vmatpush1.bf16.msra.mxu0 %v1959_v22  ;;  %v2017_v10 = vld [vmem:[#allocation2 + $0x184] ss:$8 sps:$4 sm:$0xff]   ;;  %v185_v11 = vcombine.high %v2280_v6, %v2280_v6  ;;  %v2020_v14 = vld [vmem:[#allocation2 + $0x180] ss:$8 sps:$4 sm:$0xff]   ;;  %v2024_v15 = vld [vmem:[#allocation2 + $0x274] ss:$8 sps:$4 sm:$0xff]  }
  0x25   :  { %918 = vmatpush1.bf16.msra.mxu1 %v1960_v23  ;;  %878 = vmatprep.subr.bf16.mxu0 %v1961_v24  ;;  %v206_v60 = vrot.slane %v184_v58, %v2272_v49  ;;  %v2027_v16 = vld [vmem:[#allocation2 + $0x374] ss:$8 sps:$4 sm:$0xff]   ;;  %v214_v18 = vcombine.high %v192_v13, %v192_v13  ;;  %v2022_v19 = vld [vmem:[#allocation2 + $0x270] ss:$8 sps:$4 sm:$0xff]   ;;  %v2030_v21 = vld [vmem:[#allocation2 + $0x264] ss:$8 sps:$4 sm:$0xff]  }
  0x26   :  { %919 = vmatprep.subr.bf16.mxu1 %v1963_v25  ;;  %v213_v17 = vrot.slane %v185_v11, %v2272_v49  ;;  %v2025_v20 = vld [vmem:[#allocation2 + $0x370] ss:$8 sps:$4 sm:$0xff]   ;;  %v2033_v22 = vld [vmem:[#allocation2 + $0x364] ss:$8 sps:$4 sm:$0xff]   ;;  %v2028_v24 = vld [vmem:[#allocation2 + $0x260] ss:$8 sps:$4 sm:$0xff]  }
  0x27   :  { %v216_v0 = vcombine.high %v206_v60, %v206_v60  ;;  %898 = vmatprep.mubr.bf16.mxu0 %v206_v60  ;;  %v2031_v25 = vld [vmem:[#allocation2 + $0x360] ss:$8 sps:$4 sm:$0xff]   ;;  %v2046_v36 = vld [vmem:[#allocation2 + $0x230] ss:$8 sps:$4 sm:$0xff]   ;;  %v2054_v38 = vld [vmem:[#allocation2 + $0x224] ss:$8 sps:$4 sm:$0xff]  }
  0x28   :  { %879 = vmatpush1.bf16.msra.mxu0 %v1965_v26  ;;  %v217_v23 = vcombine.high %v213_v17, %v213_v17  ;;  %v2036_v26 = vld [vmem:[#allocation2 + $0x254] ss:$8 sps:$4 sm:$0xff]   ;;  %v2049_v37 = vld [vmem:[#allocation2 + $0x330] ss:$8 sps:$4 sm:$0xff]   ;;  %v2076_v58 = vld [vmem:[#allocation2 + $0x2e0] ss:$8 sps:$4 sm:$0xff]  }
  0x29   :  { %920 = vmatpush1.bf16.msra.mxu1 %v1966_v27  ;;  %880 = vmatprep.subr.bf16.mxu0 %v1967_v28  ;;  %v2039_v27 = vld [vmem:[#allocation2 + $0x354] ss:$8 sps:$4 sm:$0xff]   ;;  %v2034_v28 = vld [vmem:[#allocation2 + $0x250] ss:$8 sps:$4 sm:$0xff]   ;;  %v2093_v1 = vld [vmem:[#allocation2 + $0x3c4] ss:$8 sps:$4 sm:$0xff]  }
  0x2a   :  { %921 = vmatprep.subr.bf16.mxu1 %v1969_v29  ;;  %939 = vmatprep.mubr.bf16.mxu1 %v216_v0  ;;  %v2037_v29 = vld [vmem:[#allocation2 + $0x350] ss:$8 sps:$4 sm:$0xff]   ;;  %v2060_v42 = vld [vmem:[#allocation2 + $0x214] ss:$8 sps:$4 sm:$0xff]   ;;  %v2090_v0 = vld [vmem:[#allocation2 + $0x2c4] ss:$8 sps:$4 sm:$0xff]  }
  0x2b   :  { %v2072_v52 = vld [vmem:[#allocation2 + $0x2f4] ss:$8 sps:$4 sm:$0xff]   ;;  %v2070_v54 = vld [vmem:[#allocation2 + $0x2f0] ss:$8 sps:$4 sm:$0xff]   ;;  %v2100_v11 = vld [vmem:[#allocation2 + $0x2a0] ss:$8 sps:$4 sm:$0xff]  }
  0x2c   :  { %881 = vmatpush1.bf16.msra.mxu0 %v1971_v30  ;;  %v2042_v30 = vld [vmem:[#allocation2 + $0x244] ss:$8 sps:$4 sm:$0xff]   ;;  %v2084_v60 = vld [vmem:[#allocation2 + $0x2d4] ss:$8 sps:$4 sm:$0xff]   ;;  %vm1618_vm2 = vcmask 517120   ;;  %s2230_s1 = smov [#allocation5]  }
  0x2d   :  { %922 = vmatpush1.bf16.msra.mxu1 %v1972_v31  ;;  %882 = vmatprep.subr.bf16.mxu0 %v1973_v32  ;;  %v2045_v31 = vld [vmem:[#allocation2 + $0x344] ss:$8 sps:$4 sm:$0xff]   ;;  %v2040_v32 = vld [vmem:[#allocation2 + $0x240] ss:$8 sps:$4 sm:$0xff]  }
  0x2e   :  { %923 = vmatprep.subr.bf16.mxu1 %v1975_v33  ;;  %v2043_v33 = vld [vmem:[#allocation2 + $0x340] ss:$8 sps:$4 sm:$0xff]  }
  0x30   :  { %883 = vmatpush2.bf16.msra.mxu0 %v1977_v34  ;;  %v2048_v34 = vld [vmem:[#allocation2 + $0x234] ss:$8 sps:$4 sm:$0xff]  }
  0x31   :  { %924 = vmatpush2.bf16.msra.mxu1 %v1978_v35  ;;  %884 = vmatprep.subr.bf16.mxu0 %v1979_v39  ;;  %v2051_v35 = vld [vmem:[#allocation2 + $0x334] ss:$8 sps:$4 sm:$0xff]   ;;  %v2057_v39 = vld [vmem:[#allocation2 + $0x324] ss:$8 sps:$4 sm:$0xff]  }
  0x32   :  { %925 = vmatprep.subr.bf16.mxu1 %v1981_v40  ;;  %v2052_v40 = vld [vmem:[#allocation2 + $0x220] ss:$8 sps:$4 sm:$0xff]  }
  0x34   :  { %885 = vmatpush2.bf16.msra.mxu0 %v1983_v41  ;;  %v2055_v41 = vld [vmem:[#allocation2 + $0x320] ss:$8 sps:$4 sm:$0xff]  }
  0x35   :  { %926 = vmatpush2.bf16.msra.mxu1 %v1984_v44  ;;  %886 = vmatprep.subr.bf16.mxu0 %v1985_v45  ;;  %v2063_v44 = vld [vmem:[#allocation2 + $0x314] ss:$8 sps:$4 sm:$0xff]   ;;  %v2058_v45 = vld [vmem:[#allocation2 + $0x210] ss:$8 sps:$4 sm:$0xff]  }
  0x36   :  { %927 = vmatprep.subr.bf16.mxu1 %v1987_v46  ;;  %v2061_v46 = vld [vmem:[#allocation2 + $0x310] ss:$8 sps:$4 sm:$0xff]  }
  0x38   :  { %887 = vmatpush2.bf16.msra.mxu0 %v1989_v47  ;;  %v2066_v47 = vld [vmem:[#allocation2 + $0x204] ss:$8 sps:$4 sm:$0xff]  }
  0x39   :  { %928 = vmatpush2.bf16.msra.mxu1 %v1990_v48  ;;  %888 = vmatprep.subr.bf16.mxu0 %v1991_v50  ;;  %v2069_v48 = vld [vmem:[#allocation2 + $0x304] ss:$8 sps:$4 sm:$0xff]   ;;  %v2064_v50 = vld [vmem:[#allocation2 + $0x200] ss:$8 sps:$4 sm:$0xff]  }
  0x3a   :  { %929 = vmatprep.subr.bf16.mxu1 %v1993_v51  ;;  %v2067_v51 = vld [vmem:[#allocation2 + $0x300] ss:$8 sps:$4 sm:$0xff]  }
  0x3c   :  { %889 = vmatpush2.bf16.msra.mxu0 %v1995_v53  ;;  %v2075_v53 = vld [vmem:[#allocation2 + $0x3f4] ss:$8 sps:$4 sm:$0xff]  }
  0x3d   :  { %930 = vmatpush2.bf16.msra.mxu1 %v1996_v55  ;;  %890 = vmatprep.subr.bf16.mxu0 %v1997_v56  ;;  %v2073_v55 = vld [vmem:[#allocation2 + $0x3f0] ss:$8 sps:$4 sm:$0xff]   ;;  %v2078_v56 = vld [vmem:[#allocation2 + $0x2e4] ss:$8 sps:$4 sm:$0xff]  }
  0x3e   :  { %931 = vmatprep.subr.bf16.mxu1 %v1999_v57  ;;  %v2081_v57 = vld [vmem:[#allocation2 + $0x3e4] ss:$8 sps:$4 sm:$0xff]  }
  0x40   :  { %891 = vmatpush2.bf16.msra.mxu0 %v2001_v59  ;;  %v2079_v59 = vld [vmem:[#allocation2 + $0x3e0] ss:$8 sps:$4 sm:$0xff]  }
  0x41   :  { %932 = vmatpush2.bf16.msra.mxu1 %v2002_v61  ;;  %892 = vmatprep.subr.bf16.mxu0 %v2003_v62  ;;  %v2087_v61 = vld [vmem:[#allocation2 + $0x3d4] ss:$8 sps:$4 sm:$0xff]   ;;  %v2082_v62 = vld [vmem:[#allocation2 + $0x2d0] ss:$8 sps:$4 sm:$0xff]  }
  0x42   :  { %933 = vmatprep.subr.bf16.mxu1 %v2005_v63  ;;  %v2085_v63 = vld [vmem:[#allocation2 + $0x3d0] ss:$8 sps:$4 sm:$0xff]  }
  0x44   :  { %893 = vmatpush2.bf16.msra.mxu0 %v2007_v2  ;;  %v2088_v2 = vld [vmem:[#allocation2 + $0x2c0] ss:$8 sps:$4 sm:$0xff]  }
  0x45   :  { %934 = vmatpush2.bf16.msra.mxu1 %v2008_v3  ;;  %894 = vmatprep.subr.bf16.mxu0 %v2009_v4  ;;  %v2091_v3 = vld [vmem:[#allocation2 + $0x3c0] ss:$8 sps:$4 sm:$0xff]   ;;  %v2096_v4 = vld [vmem:[#allocation2 + $0x2b4] ss:$8 sps:$4 sm:$0xff]  }
  0x46   :  { %935 = vmatprep.subr.bf16.mxu1 %v2011_v5  ;;  %v2099_v5 = vld [vmem:[#allocation2 + $0x3b4] ss:$8 sps:$4 sm:$0xff]  }
  0x48   :  { %895 = vmatpush2.bf16.msra.mxu0 %v2013_v7  ;;  %v2094_v7 = vld [vmem:[#allocation2 + $0x2b0] ss:$8 sps:$4 sm:$0xff]  }
  0x49   :  { %936 = vmatpush2.bf16.msra.mxu1 %v2014_v8  ;;  %896 = vmatprep.subr.bf16.mxu0 %v2015_v9  ;;  %v2097_v8 = vld [vmem:[#allocation2 + $0x3b0] ss:$8 sps:$4 sm:$0xff]   ;;  %v2102_v9 = vld [vmem:[#allocation2 + $0x2a4] ss:$8 sps:$4 sm:$0xff]  }
  0x4a   :  { %937 = vmatprep.subr.bf16.mxu1 %v2017_v10  ;;  %v2105_v10 = vld [vmem:[#allocation2 + $0x3a4] ss:$8 sps:$4 sm:$0xff]  }
  0x4c   :  { %897 = vmatpush2.bf16.msra.mxu0 %v2019_v12  ;;  %v2103_v12 = vld [vmem:[#allocation2 + $0x3a0] ss:$8 sps:$4 sm:$0xff]  }
  0x4d   :  { %938 = vmatpush2.bf16.msra.mxu1 %v2020_v14  ;;  %948 = vmatprep.subr.bf16.mxu0 %v2024_v15  ;;  %v2111_v14 = vld [vmem:[#allocation2 + $0x394] ss:$8 sps:$4 sm:$0xff]   ;;  %v2106_v15 = vld [vmem:[#allocation2 + $0x290] ss:$8 sps:$4 sm:$0xff]  }
  0x4e   :  { %989 = vmatprep.subr.bf16.mxu1 %v2027_v16  ;;  %v2109_v16 = vld [vmem:[#allocation2 + $0x390] ss:$8 sps:$4 sm:$0xff]  }
  0x4f   :  { %899 = vmatmul.mubr.bf16.vlgmr.msra.gmra.mxu0 %v192_v13  ;;  %v2108_v13 = vld [vmem:[#allocation2 + $0x294] ss:$8 sps:$4 sm:$0xff]  }
  0x50   :  { %940 = vmatmul.mubr.bf16.vlgmr.msra.gmra.mxu1 %v214_v18  ;;  %949 = vmatpush1.bf16.msra.mxu0 %v2022_v19  ;;  %v2117_v18 = vld [vmem:[#allocation2 + $0x384] ss:$8 sps:$4 sm:$0xff]   ;;  %v199_v19 = vrot.slane %v2280_v6, %v2272_v49 }
  0x51   :  { %990 = vmatpush1.bf16.msra.mxu1 %v2025_v20  ;;  %950 = vmatprep.subr.bf16.mxu0 %v2030_v21  ;;  %v2112_v20 = vld [vmem:[#allocation2 + $0x280] ss:$8 sps:$4 sm:$0xff]  }
  0x52   :  { %991 = vmatprep.subr.bf16.mxu1 %v2033_v22  ;;  %980 = vmatprep.mubr.bf16.mxu0 %v213_v17  ;;  %v2114_v17 = vld [vmem:[#allocation2 + $0x284] ss:$8 sps:$4 sm:$0xff]   ;;  %v2115_v21 = vld [vmem:[#allocation2 + $0x380] ss:$8 sps:$4 sm:$0xff]   ;;  %v215_v22 = vcombine.high %v199_v19, %v199_v19 }
  0x53   :  { %1021 = vmatprep.mubr.bf16.mxu1 %v217_v23 }
  0x54   :  { %951 = vmatpush1.bf16.msra.mxu0 %v2028_v24 }
  0x55   :  { %992 = vmatpush1.bf16.msra.mxu1 %v2031_v25  ;;  %952 = vmatprep.subr.bf16.mxu0 %v2036_v26 }
  0x56   :  { %993 = vmatprep.subr.bf16.mxu1 %v2039_v27 }
  0x58   :  { %953 = vmatpush1.bf16.msra.mxu0 %v2034_v28 }
  0x59   :  { %994 = vmatpush1.bf16.msra.mxu1 %v2037_v29  ;;  %954 = vmatprep.subr.bf16.mxu0 %v2042_v30 }
  0x5a   :  { %995 = vmatprep.subr.bf16.mxu1 %v2045_v31  ;;  %v2118_v31 = vld [vmem:[%s2470_s2 + $0x78] sm:$0xff]  }
  0x5c   :  { %955 = vmatpush1.bf16.msra.mxu0 %v2040_v32  ;;  %v2119_v32 = vld [vmem:[%s2470_s2 + $0x38] sm:$0xff]  }
  0x5d   :  { %996 = vmatpush1.bf16.msra.mxu1 %v2043_v33  ;;  %956 = vmatprep.subr.bf16.mxu0 %v2048_v34  ;;  %v2120_v33 = vld [vmem:[%s2470_s2 + $0x70] sm:$0xff]  }
  0x5e   :  { %997 = vmatprep.subr.bf16.mxu1 %v2051_v35  ;;  %v2121_v34 = vld [vmem:[%s2470_s2 + $0x30] sm:$0xff]   ;;  %v2122_v35 = vld [vmem:[%s2470_s2 + $0x68] sm:$0xff]  }
  0x60   :  { %957 = vmatpush1.bf16.msra.mxu0 %v2046_v36  ;;  %v2123_v36 = vld [vmem:[%s2470_s2 + $0x28] sm:$0xff]  }
  0x61   :  { %998 = vmatpush1.bf16.msra.mxu1 %v2049_v37  ;;  %958 = vmatprep.subr.bf16.mxu0 %v2054_v38  ;;  %v2124_v37 = vld [vmem:[%s2470_s2 + $0x60] sm:$0xff]  }
  0x62   :  { %999 = vmatprep.subr.bf16.mxu1 %v2057_v39  ;;  %v2125_v38 = vld [vmem:[%s2470_s2 + $0x20] sm:$0xff]   ;;  %v2126_v39 = vld [vmem:[%s2470_s2 + $0x58] sm:$0xff]  }
  0x64   :  { %959 = vmatpush1.bf16.msra.mxu0 %v2052_v40  ;;  %v2127_v40 = vld [vmem:[%s2470_s2 + $0x18] sm:$0xff]  }
  0x65   :  { %1000 = vmatpush1.bf16.msra.mxu1 %v2055_v41  ;;  %960 = vmatprep.subr.bf16.mxu0 %v2060_v42  ;;  %v2128_v41 = vld [vmem:[%s2470_s2 + $0x50] sm:$0xff]  }
  0x66   :  { %1001 = vmatprep.subr.bf16.mxu1 %v2063_v44  ;;  %v2129_v42 = vld [vmem:[%s2470_s2 + $0x10] sm:$0xff]   ;;  %v2130_v44 = vld [vmem:[%s2470_s2 + $0x48] sm:$0xff]  }
  0x68   :  { %961 = vmatpush1.bf16.msra.mxu0 %v2058_v45  ;;  %v2131_v45 = vld [vmem:[%s2470_s2 + $0x8] sm:$0xff]  }
  0x69   :  { %1002 = vmatpush1.bf16.msra.mxu1 %v2061_v46  ;;  %962 = vmatprep.subr.bf16.mxu0 %v2066_v47  ;;  %v2132_v46 = vld [vmem:[%s2470_s2 + $0x40] sm:$0xff]  }
  0x6a   :  { %1003 = vmatprep.subr.bf16.mxu1 %v2069_v48  ;;  %v2133_v47 = vld [vmem:[%s2470_s2] sm:$0xff]  }
  0x6c   :  { %963 = vmatpush1.bf16.msra.mxu0 %v2064_v50 }
  0x6d   :  { %1004 = vmatpush1.bf16.msra.mxu1 %v2067_v51  ;;  %964 = vmatprep.subr.bf16.mxu0 %v2072_v52 }
  0x6e   :  { %1005 = vmatprep.subr.bf16.mxu1 %v2075_v53 }
  0x70   :  { %965 = vmatpush2.bf16.msra.mxu0 %v2070_v54 }
  0x71   :  { %1006 = vmatpush2.bf16.msra.mxu1 %v2073_v55  ;;  %966 = vmatprep.subr.bf16.mxu0 %v2078_v56 }
  0x72   :  { %1007 = vmatprep.subr.bf16.mxu1 %v2081_v57 }
  0x74   :  { %967 = vmatpush2.bf16.msra.mxu0 %v2076_v58 }
  0x75   :  { %1008 = vmatpush2.bf16.msra.mxu1 %v2079_v59  ;;  %968 = vmatprep.subr.bf16.mxu0 %v2084_v60 }
  0x76   :  { %1009 = vmatprep.subr.bf16.mxu1 %v2087_v61 }
  0x78   :  { %969 = vmatpush2.bf16.msra.mxu0 %v2082_v62 }
  0x79   :  { %1010 = vmatpush2.bf16.msra.mxu1 %v2085_v63  ;;  %970 = vmatprep.subr.bf16.mxu0 %v2090_v0 }
  0x7a   :  { %1011 = vmatprep.subr.bf16.mxu1 %v2093_v1 }
  0x7c   :  { %971 = vmatpush2.bf16.msra.mxu0 %v2088_v2 }
  0x7d   :  { %1012 = vmatpush2.bf16.msra.mxu1 %v2091_v3  ;;  %972 = vmatprep.subr.bf16.mxu0 %v2096_v4 }
  0x7e   :  { %1013 = vmatprep.subr.bf16.mxu1 %v2099_v5 }
  0x80   :  { %973 = vmatpush2.bf16.msra.mxu0 %v2094_v7 }
  0x81   :  { %1014 = vmatpush2.bf16.msra.mxu1 %v2097_v8  ;;  %974 = vmatprep.subr.bf16.mxu0 %v2102_v9 }
  0x82   :  { %1015 = vmatprep.subr.bf16.mxu1 %v2105_v10 }
  0x84   :  { %975 = vmatpush2.bf16.msra.mxu0 %v2100_v11 }
  0x85   :  { %1016 = vmatpush2.bf16.msra.mxu1 %v2103_v12  ;;  %976 = vmatprep.subr.bf16.mxu0 %v2108_v13 }
  0x86   :  { %1017 = vmatprep.subr.bf16.mxu1 %v2111_v14 }
  0x88   :  { %977 = vmatpush2.bf16.msra.mxu0 %v2106_v15 }
  0x89   :  { %1018 = vmatpush2.bf16.msra.mxu1 %v2109_v16  ;;  %978 = vmatprep.subr.bf16.mxu0 %v2114_v17 }
  0x8a   :  { %1019 = vmatprep.subr.bf16.mxu1 %v2117_v18 }
  0x8c   :  { %979 = vmatpush2.bf16.msra.mxu0 %v2112_v20 }
  0x8d   :  { %1020 = vmatpush2.bf16.msra.mxu1 %v2115_v21  ;;  %1838 = vmatprep.subr.bf16.mxu0 %v2118_v31 }
  0x8f   :  { %981 = vmatmul.mubr.bf16.vlgmr.msra.gmra.mxu0 %v199_v19 }
  0x90   :  { %1022 = vmatmul.mubr.bf16.vlgmr.msra.gmra.mxu1 %v215_v22  ;;  %1839 = vmatpush3.bf16.msra.mxu0 %v2119_v32 }
  0x91   :  { %1840 = vmatprep.subr.bf16.mxu0 %v2120_v33 }
  0x94   :  { %1841 = vmatpush3.bf16.msra.mxu0 %v2121_v34 }
  0x95   :  { %1842 = vmatprep.subr.bf16.mxu0 %v2122_v35 }
  0x98   :  { %1843 = vmatpush3.bf16.msra.mxu0 %v2123_v36 }
  0x99   :  { %1844 = vmatprep.subr.bf16.mxu0 %v2124_v37 }
  0x9c   :  { %1845 = vmatpush3.bf16.msra.mxu0 %v2125_v38 }
  0x9d   :  { %1846 = vmatprep.subr.bf16.mxu0 %v2126_v39 }
  0xa0   :  { %1847 = vmatpush3.bf16.msra.mxu0 %v2127_v40 }
  0xa1   :  { %1848 = vmatprep.subr.bf16.mxu0 %v2128_v41 }
  0xa4   :  { %1849 = vmatpush3.bf16.msra.mxu0 %v2129_v42 }
  0xa5   :  { %1850 = vmatprep.subr.bf16.mxu0 %v2130_v44 }
  0xa8   :  { %1851 = vmatpush3.bf16.msra.mxu0 %v2131_v45  ;;  %v1071_v45 = vld [vmem:[%s2473_s5] ss:$2 sm:$0x3] }
  0xa9   :  { %1852 = vmatprep.subr.bf16.mxu0 %v2132_v46 }
  0xac   :  { %1853 = vmatpush3.bf16.msra.mxu0 %v2133_v47  ;;  %v2356_v47 = vsub.s32 0, %v2269_v43 }
 0x10f   :  { %v900_v23 = vpop.f32.mrf.mxu0 }
 0x110   :  { %v941_v24 = vpop.f32.mrf.mxu1 }
 0x111   :  { %v942_v25 = vadd.f32 %v941_v24, %v900_v23  ;;  %v902_v26 = vpop.f32.mrf.mxu0 }
 0x112   :  { %v943_v27 = vpop.f32.mrf.mxu1 }
 0x113   :  { %v904_v28 = vpop.f32.mrf.mxu0  ;;  %v944_v51 = vadd.f32 %v943_v27, %v902_v26 }
 0x114   :  { %v945_v29 = vpop.f32.mrf.mxu1 }
 0x115   :  { %v905_v30 = vpop.f32.mrf.mxu0 }
 0x116   :  { %v946_v6 = vpop.f32.mrf.mxu1 }
 0x14f   :  { %v982_v48 = vpop.f32.mrf.mxu0 }
 0x150   :  { %v1023_v50 = vpop.f32.mrf.mxu1  ;;  %v983_v52 = vadd.f32 %v982_v48, %v942_v25  ;;  %v1104_v48 = vsub.s32 1, %v2269_v43 }
 0x151   :  { %v984_v53 = vpop.f32.mrf.mxu0 }
 0x152   :  { %v1025_v54 = vpop.f32.mrf.mxu1  ;;  %v2336_v55 = vadd.f32 %v1023_v50, %v983_v52  ;;  %v985_v56 = vadd.f32 %v984_v53, %v944_v51 }
 0x153   :  { %v986_v57 = vpop.f32.mrf.mxu0 }
 0x154   :  { %v1027_v58 = vpop.f32.mrf.mxu1  ;;  %v1031_v59 = vsel %vm1030_vm0, %v2336_v55, 0.0  ;;  %v1045_v60 = vmul.f32 %v2336_v55, %v2336_v55  ;;  %v2342_v61 = vadd.f32 %v1025_v54, %v985_v56 }
 0x155   :  { %v1032_v62 = vrot.slane %v1031_v59, 4  ;;  %v987_v63 = vpop.f32.mrf.mxu0  ;;  %v1805_v58 = vld [vmem:[%s2473_s5 + $0x1] ss:$2 sm:$0x3] }
 0x156   :  { %v1028_v0 = vpop.f32.mrf.mxu1  ;;  %v1047_v1 = vsel %vm1030_vm0, %v1045_v60, 0.0  ;;  %v1038_v2 = vsel %vm1030_vm0, %v2342_v61, 0.0  ;;  %v1046_v3 = vmul.f32 %v2342_v61, %v2342_v61 }
 0x157   :  { %v1033_v4 = vadd.f32 %v1032_v62, %v1031_v59  ;;  %v1048_v5 = vrot.slane %v1047_v1, 4  ;;  %v1039_v7 = vrot.slane %v1038_v2, 4 }
 0x158   :  { %v1054_v8 = vsel %vm1030_vm0, %v1046_v3, 0.0 }
 0x159   :  { %v1034_v9 = vrot.slane %v1033_v4, 2  ;;  %v1049_v10 = vadd.f32 %v1048_v5, %v1047_v1  ;;  %v1040_v11 = vadd.f32 %v1039_v7, %v1038_v2  ;;  %v1055_v12 = vrot.slane %v1054_v8, 4 }
 0x15b   :  { %v1035_v13 = vadd.f32 %v1034_v9, %v1033_v4  ;;  %v1050_v14 = vrot.slane %v1049_v10, 2  ;;  %v1041_v15 = vrot.slane %v1040_v11, 2  ;;  %v1056_v16 = vadd.f32 %v1055_v12, %v1054_v8 }
 0x15d   :  { %v1036_v17 = vrot.slane %v1035_v13, 1  ;;  %v1051_v18 = vadd.f32 %v1050_v14, %v1049_v10  ;;  %v1042_v19 = vadd.f32 %v1041_v15, %v1040_v11  ;;  %v1057_v20 = vrot.slane %v1056_v16, 2  ;;  %v2135_v15 = vld [vmem:[%s2471_s3 + $0x30] sm:$0xff]  }
 0x15e   :  { %v2228_v14 = vmov 0.0  }
 0x15f   :  { %v1037_v21 = vadd.f32 %v1036_v17, %v1035_v13  ;;  %v1052_v22 = vrot.slane %v1051_v18, 1  ;;  %v1043_v23 = vrot.slane %v1042_v19, 1  ;;  %v1058_v24 = vadd.f32 %v1057_v20, %v1056_v16  ;;  %v2134_v13 = vld [vmem:[%s2471_s3 + $0x38] sm:$0xff]   ;;  %1878 = vmatprep.subr.bf16.mxu1 %v2228_v14  ;;  %1894 = vmatprep.mubr.msk.bf16.mxu1 %vm2229_vm1, %v2228_v14  ;;  %v2136_v16 = vld [vmem:[%s2471_s3 + $0x28] sm:$0xff]   ;;  %v2137_v17 = vld [vmem:[%s2471_s3 + $0x20] sm:$0xff]  }
 0x160   :  { %1879 = vmatpush3.bf16.msra.mxu1 %v2134_v13  ;;  %1898 = vmatprep.subr.bf16.mxu0 %v2228_v14  ;;  %v2140_v20 = vld [vmem:[%s2471_s3 + $0x8] sm:$0xff]  }
 0x161   :  { %v1053_v25 = vadd.f32 %v1052_v22, %v1051_v18  ;;  %v1061_v26 = vmul.f32 0.5, %v1037_v21  ;;  %v1044_v27 = vadd.f32 %v1043_v23, %v1042_v19  ;;  %v1059_v28 = vrot.slane %v1058_v24, 1  ;;  %1880 = vmatprep.subr.bf16.mxu1 %v2228_v14  ;;  %v2138_v18 = vld [vmem:[%s2471_s3 + $0x18] sm:$0xff]   ;;  %v2139_v19 = vld [vmem:[%s2471_s3 + $0x10] sm:$0xff]   ;;  %v2141_v21 = vld [vmem:[%s2471_s3] sm:$0xff]   ;;  %s1668_s3 = sshll.u32 %s2230_s1, 4  ;;  %s1669_s3 = int_to_ptr.vmem [resolvable:$true] %s1668_s3 }
 0x162   :  { %p2205_p6 = scmp.lt.s32.totalorder %s1669_s3, %s1669_s3 }
 0x163   :  { %v1063_v29 = vmul.f32 0.5, %v1053_v25  ;;  %v1065_v30 = vmul.f32 %v1061_v26, %v1061_v26  ;;  %v1060_v6 = vadd.f32 %v1059_v28, %v1058_v24  ;;  %v1062_v31 = vmul.f32 0.5, %v1044_v27 }
 0x164   :  { %1881 = vmatpush3.bf16.msra.mxu1 %v2135_v15 }
 0x165   :  { %v1067_v32 = vsub.f32 %v1063_v29, %v1065_v30  ;;  %v1064_v33 = vmul.f32 0.5, %v1060_v6  ;;  %v1066_v34 = vmul.f32 %v1062_v31, %v1062_v31  ;;  %1882 = vmatprep.subr.bf16.mxu1 %v2228_v14 }
 0x167   :  { %v1069_v35 = vmax.f32 %v1067_v32, 0.0  ;;  %v1068_v36 = vsub.f32 %v1064_v33, %v1066_v34 }
 0x168   :  { %1883 = vmatpush3.bf16.msra.mxu1 %v2136_v16 }
 0x169   :  { %v1074_v37 = vadd.f32 1e-05, %v1069_v35  ;;  %v1070_v38 = vmax.f32 %v1068_v36, 0.0  ;;  %1884 = vmatprep.subr.bf16.mxu1 %v2228_v14 }
 0x16b   :  { %v1075_v39 = vadd.f32 1e-05, %v1070_v38  ;;  %2150 = vrsqrt.f32 %v1074_v37 }
 0x16c   :  { %1885 = vmatpush3.bf16.msra.mxu1 %v2137_v17 }
 0x16d   :  { %2152 = vrsqrt.f32 %v1075_v39  ;;  %1886 = vmatprep.subr.bf16.mxu1 %v2228_v14 }
 0x170   :  { %1887 = vmatpush3.bf16.msra.mxu1 %v2138_v18 }
 0x171   :  { %1888 = vmatprep.subr.bf16.mxu1 %v2228_v14 }
 0x174   :  { %1889 = vmatpush3.bf16.msra.mxu1 %v2139_v19 }
 0x175   :  { %1890 = vmatprep.subr.bf16.mxu1 %v2228_v14 }
 0x178   :  { %v2151_v40 = vpop.eup %2150  ;;  %1891 = vmatpush3.bf16.msra.mxu1 %v2140_v20 }
 0x179   :  { %1892 = vmatprep.subr.bf16.mxu1 %v2228_v14 }
 0x17a   :  { %v2153_v41 = vpop.eup %2152 }
 0x17b   :  { %v1080_v42 = vcombine.low %v2151_v40, %v2153_v41 }
 0x17c   :  { %1893 = vmatpush3.bf16.msra.mxu1 %v2141_v21 }
 0x17d   :  { %v1087_v44 = vrot.slane %v1080_v42, %v2272_v49 }
 0x17f   :  { %v1094_v46 = vrot.slane %v1087_v44, %v2272_v49 }
 0x181   :  { %v1096_v50 = vmul.f32 %v1094_v46, %v1071_v45 }
 0x183   :  { %v1101_v51 = vrot.slane %v1096_v50, %v2356_v47  ;;  %v1105_v52 = vrot.slane %v1096_v50, %v1104_v48  ;;  %v1344_v50 = vld [vmem:[%s2473_s5 + $0x4] sm:$0x1] }
 0x185   :  { %v1108_v53 = vmul.f32 %v1101_v51, %v1061_v26  ;;  %v1109_v54 = vmul.f32 %v1105_v52, %v1062_v31  ;;  %v1129_v62 = vmul.f32 %v1101_v51, %v2336_v55  ;;  %v1130_v43 = vmul.f32 %v1105_v52, %v2342_v61 }
 0x187   :  { %v1112_v56 = vcombine.low %v1108_v53, %v1109_v54  ;;  %v1345_v53 = vld [vmem:[%s2473_s5 + $0x5] sm:$0x1] }
 0x189   :  { %v1119_v57 = vrot.slane %v1112_v56, %v2272_v49 }
 0x18b   :  { %v1126_v59 = vrot.slane %v1119_v57, %v2272_v49 }
 0x18d   :  { %v1128_v60 = vsub.f32 %v1805_v58, %v1126_v59 }
 0x18f   :  { %v1135_v63 = vrot.slane %v1128_v60, %v2356_v47  ;;  %v1139_v0 = vrot.slane %v1128_v60, %v1104_v48 }
 0x191   :  { %v1142_v1 = vadd.f32 %v1135_v63, %v1129_v62  ;;  %v1143_v2 = vadd.f32 %v1139_v0, %v1130_v43 }
 0x193   :  { %v1144_v3 = vsub.f32 0.0, %v1142_v1  ;;  %v1145_v4 = vsub.f32 0.0, %v1143_v2 }
 0x195   :  { %v1148_v5 = vmul.f32 1.442695, %v1145_v4  ;;  %v1146_v7 = vmul.f32 1.442695, %v1144_v3  ;;  %v2142_v3 = vld [vmem:[%s2472_s4 + $0x38] sm:$0xff]   ;;  %v2143_v4 = vld [vmem:[%s2472_s4 + $0x30] sm:$0xff]  }
 0x197   :  { %2154 = vpow2.f32 %v1148_v5  ;;  %v2144_v5 = vld [vmem:[%s2472_s4 + $0x28] sm:$0xff]  }
 0x198   :  { %2156 = vpow2.f32 %v1146_v7  ;;  %v2145_v7 = vld [vmem:[%s2472_s4 + $0x20] sm:$0xff]  }
 0x1a4   :  { %v2155_v8 = vpop.eup %2154 }
 0x1a5   :  { %v2157_v9 = vpop.eup %2156  ;;  %v1151_v10 = vadd.f32 1.0, %v2155_v8  ;;  %v2146_v8 = vld [vmem:[%s2472_s4 + $0x18] sm:$0xff]  }
 0x1a6   :  { %v1150_v49 = vadd.f32 1.0, %v2157_v9  ;;  %v2147_v9 = vld [vmem:[%s2472_s4 + $0x10] sm:$0xff]  }
 0x1a7   :  { %2158 = vrcp.f32 %v1151_v10  ;;  %v2148_v10 = vld [vmem:[%s2472_s4 + $0x8] sm:$0xff]  }
 0x1a8   :  { %2160 = vrcp.f32 %v1150_v49  ;;  %v2149_v49 = vld [vmem:[%s2472_s4] sm:$0xff]  }
 0x1b4   :  { %v2159_v55 = vpop.eup %2158 }
 0x1b5   :  { %v2161_v11 = vpop.eup %2160  ;;  %v1155_v61 = vpack.c.bf16 %v2159_v55, %v2159_v55 }
 0x1b6   :  { %v1154_v12 = vpack.c.bf16 %v2161_v11, %v2161_v11 }
 0x1b7   :  { %1316 = vmatprep.mubr.bf16.mxu0 %v1155_v61 }
 0x1b8   :  { %1317 = vmatmul.mubr.bf16.vlgmr.msra.gmra.mxu0 %v1154_v12 }
 0x1b9   :  { %1914 = vmatprep.mubr.msk.bf16.mxu0 %vm2229_vm1, %v2228_v14  ;;  %1899 = vmatpush3.bf16.msra.mxu0 %v2142_v3 }
 0x1ba   :  { %1900 = vmatprep.subr.bf16.mxu0 %v2228_v14 }
 0x1bd   :  { %1901 = vmatpush3.bf16.msra.mxu0 %v2143_v4 }
 0x1be   :  { %1902 = vmatprep.subr.bf16.mxu0 %v2228_v14 }
 0x1c1   :  { %1903 = vmatpush3.bf16.msra.mxu0 %v2144_v5 }
 0x1c2   :  { %1904 = vmatprep.subr.bf16.mxu0 %v2228_v14 }
 0x1c5   :  { %1905 = vmatpush3.bf16.msra.mxu0 %v2145_v7 }
 0x1c6   :  { %1906 = vmatprep.subr.bf16.mxu0 %v2228_v14 }
 0x1c9   :  { %1907 = vmatpush3.bf16.msra.mxu0 %v2146_v8 }
 0x1ca   :  { %1908 = vmatprep.subr.bf16.mxu0 %v2228_v14 }
 0x1cd   :  { %1909 = vmatpush3.bf16.msra.mxu0 %v2147_v9 }
 0x1ce   :  { %1910 = vmatprep.subr.bf16.mxu0 %v2228_v14 }
 0x1d1   :  { %1911 = vmatpush3.bf16.msra.mxu0 %v2148_v10 }
 0x1d2   :  { %1912 = vmatprep.subr.bf16.mxu0 %v2228_v14 }
 0x1d5   :  { %1913 = vmatpush3.bf16.msra.mxu0 %v2149_v49 }
 0x278   :  { %v1854_v22 = vpop.f32.mrf.mxu0 }
 0x27a   :  { %v1855_v23 = vpop.f32.mrf.mxu0 }
 0x27b   :  { %v1856_v24 = vadd.f32 %v1855_v23, %v1854_v22 }
 0x27c   :  { %v1857_v25 = vpop.f32.mrf.mxu0 }
 0x27d   :  { %v1324_v26 = vsel %vm1030_vm0, %v1856_v24, 0.0  ;;  %v1331_v27 = vmul.f32 %v1856_v24, %v1856_v24 }
 0x27e   :  { %v1325_v28 = vrot.slane %v1324_v26, 4  ;;  %v1858_v29 = vpop.f32.mrf.mxu0 }
 0x27f   :  { %v1332_v30 = vsel %vm1030_vm0, %v1331_v27, 0.0 }
 0x280   :  { %v1326_v6 = vadd.f32 %v1325_v28, %v1324_v26  ;;  %v1333_v31 = vrot.slane %v1332_v30, 4 }
 0x282   :  { %v1327_v32 = vrot.slane %v1326_v6, 2  ;;  %v1334_v33 = vadd.f32 %v1333_v31, %v1332_v30 }
 0x284   :  { %v1328_v34 = vadd.f32 %v1327_v32, %v1326_v6  ;;  %v1335_v35 = vrot.slane %v1334_v33, 2 }
 0x286   :  { %v1329_v36 = vrot.slane %v1328_v34, 1  ;;  %v1336_v37 = vadd.f32 %v1335_v35, %v1334_v33  ;;  %v1491_v33 = vld [vmem:[%s2473_s5 + $0x6] sm:$0x1] }
 0x288   :  { %v1330_v38 = vadd.f32 %v1329_v36, %v1328_v34  ;;  %v1337_v39 = vrot.slane %v1336_v37, 1  ;;  %v1492_v36 = vld [vmem:[%s2473_s5 + $0x7] sm:$0x1] }
 0x28a   :  { %v1338_v40 = vadd.f32 %v1337_v39, %v1336_v37  ;;  %v1339_v41 = vmul.f32 0.5, %v1330_v38 }
 0x28c   :  { %v1340_v42 = vmul.f32 0.5, %v1338_v40  ;;  %v1341_v44 = vmul.f32 %v1339_v41, %v1339_v41 }
 0x28e   :  { %v1342_v45 = vsub.f32 %v1340_v42, %v1341_v44 }
 0x290   :  { %v1343_v46 = vmax.f32 %v1342_v45, 0.0 }
 0x292   :  { %v1346_v48 = vadd.f32 1e-05, %v1343_v46 }
 0x294   :  { %2162 = vrsqrt.f32 %v1346_v48 }
 0x2a1   :  { %v2163_v51 = vpop.eup %2162 }
 0x2a2   :  { %v1348_v52 = vmul.f32 %v2163_v51, %v1344_v50 }
 0x2a4   :  { %v1349_v54 = vmul.f32 %v1348_v52, %v1339_v41  ;;  %v1354_v56 = vrot.slane %v1348_v52, %v2356_v47 }
 0x2a6   :  { %v1350_v57 = vsub.f32 %v1345_v53, %v1349_v54  ;;  %v1355_v58 = vmul.f32 %v1856_v24, %v1354_v56 }
 0x2a8   :  { %v1359_v59 = vrot.slane %v1350_v57, %v2356_v47 }
 0x2aa   :  { %v1360_v60 = vadd.f32 %v1359_v59, %v1355_v58 }
 0x2ac   :  { %v1361_v62 = vsub.f32 0.0, %v1360_v60 }
 0x2ae   :  { %v1362_v43 = vmul.f32 1.442695, %v1361_v62 }
 0x2b0   :  { %2164 = vpow2.f32 %v1362_v43 }
 0x2bd   :  { %v2165_v63 = vpop.eup %2164 }
 0x2be   :  { %v1364_v0 = vadd.f32 1.0, %v2165_v63 }
 0x2c0   :  { %2166 = vrcp.f32 %v1364_v0 }
 0x2cd   :  { %v2167_v1 = vpop.eup %2166 }
 0x2ce   :  { %v1366_v2 = vpack.c.bf16 %v2167_v1, %v2167_v1 }
 0x2d0   :  { %1895 = vmatmul.mubr.bf16.vlgmr.msra.gmra.mxu1 %v1366_v2 }
 0x390   :  { %v1465_v55 = vpop.f32.mrf.mxu1 }
 0x391   :  { %v1471_v11 = vsel %vm1030_vm0, %v1465_v55, 0.0  ;;  %v1478_v61 = vmul.f32 %v1465_v55, %v1465_v55 }
 0x392   :  { %v1472_v12 = vrot.slane %v1471_v11, 4  ;;  %v1896_v13 = vpop.f32.mrf.mxu1 }
 0x393   :  { %v1479_v15 = vsel %vm1030_vm0, %v1478_v61, 0.0 }
 0x394   :  { %v1473_v16 = vadd.f32 %v1472_v12, %v1471_v11  ;;  %v1480_v17 = vrot.slane %v1479_v15, 4  ;;  %v1468_v18 = vpop.f32.mrf.mxu1  ;;  %v1639_v12 = vld [vmem:[%s2473_s5 + $0x8] sm:$0x1] }
 0x396   :  { %v1474_v19 = vrot.slane %v1473_v16, 2  ;;  %v1481_v20 = vadd.f32 %v1480_v17, %v1479_v15  ;;  %v1897_v21 = vpop.f32.mrf.mxu1 }
 0x398   :  { %v1475_v22 = vadd.f32 %v1474_v19, %v1473_v16  ;;  %v1482_v23 = vrot.slane %v1481_v20, 2  ;;  %v1640_v16 = vld [vmem:[%s2473_s5 + $0x9] sm:$0x1]  ;;  %s2200_s5 = scalar_lea.vmem %s1669_s3, 32 }
 0x399   :  { %p2201_p5 = scmp.ne.s32.totalorder %s1669_s3, %s2200_s5  ;;  %p2206_p7 = scmp.lt.s32.totalorder %s2200_s5, %s2200_s5 }
 0x39a   :  { %v1476_v24 = vrot.slane %v1475_v22, 1  ;;  %v1483_v25 = vadd.f32 %v1482_v23, %v1481_v20 }
 0x39b   :  { %p2207_p8 = por %p2206_p7, %p2205_p6 }
 0x39c   :  { %v1477_v14 = vadd.f32 %v1476_v24, %v1475_v22  ;;  %v1484_v26 = vrot.slane %v1483_v25, 1 }
 0x39d   :  { %p2208_p9 = pnand %p2207_p8, %p2201_p5 }
 0x39e   :  { %v1485_v27 = vadd.f32 %v1484_v26, %v1483_v25  ;;  %v1486_v28 = vmul.f32 0.5, %v1477_v14 }
 0x3a0   :  { %v1487_v29 = vmul.f32 0.5, %v1485_v27  ;;  %v1488_v30 = vmul.f32 %v1486_v28, %v1486_v28 }
 0x3a2   :  { %v1489_v6 = vsub.f32 %v1487_v29, %v1488_v30 }
 0x3a4   :  { %v1490_v31 = vmax.f32 %v1489_v6, 0.0 }
 0x3a6   :  { %v1493_v32 = vadd.f32 1e-05, %v1490_v31 }
 0x3a8   :  { %2168 = vrsqrt.f32 %v1493_v32 }
 0x3b5   :  { %v2169_v34 = vpop.eup %2168 }
 0x3b6   :  { %v1495_v35 = vmul.f32 %v2169_v34, %v1491_v33 }
 0x3b8   :  { %v1496_v37 = vmul.f32 %v1495_v35, %v1486_v28  ;;  %v1501_v38 = vrot.slane %v1495_v35, %v2356_v47 }
 0x3ba   :  { %v1497_v39 = vsub.f32 %v1492_v36, %v1496_v37  ;;  %v1502_v40 = vmul.f32 %v1501_v38, %v1465_v55 }
 0x3bc   :  { %v1506_v41 = vrot.slane %v1497_v39, %v2356_v47 }
 0x3be   :  { %v1507_v42 = vadd.f32 %v1506_v41, %v1502_v40 }
 0x3c0   :  { %v1508_v44 = vsub.f32 0.0, %v1507_v42 }
 0x3c2   :  { %v1509_v45 = vmul.f32 1.442695, %v1508_v44 }
 0x3c4   :  { %2170 = vpow2.f32 %v1509_v45 }
 0x3d1   :  { %v2171_v46 = vpop.eup %2170 }
 0x3d2   :  { %v1511_v48 = vadd.f32 1.0, %v2171_v46 }
 0x3d4   :  { %2172 = vrcp.f32 %v1511_v48 }
 0x3e1   :  { %v2173_v50 = vpop.eup %2172 }
 0x3e2   :  { %v1513_v51 = vpack.c.bf16 %v2173_v50, %v2173_v50 }
 0x3e4   :  { %1915 = vmatmul.mubr.bf16.vlgmr.msra.gmra.mxu0 %v1513_v51 }
 0x4a4   :  { %v1612_v52 = vpop.f32.mrf.mxu0 }
 0x4a5   :  { %v1619_v53 = vsel %vm1618_vm2, %v1612_v52, 0.0  ;;  %v1626_v54 = vmul.f32 %v1612_v52, %v1612_v52 }
 0x4a6   :  { %v1620_v56 = vrot.slane %v1619_v53, 4  ;;  %v1916_v57 = vpop.f32.mrf.mxu0 }
 0x4a7   :  { %v1627_v58 = vsel %vm1618_vm2, %v1626_v54, 0.0 }
 0x4a8   :  { %v1621_v59 = vadd.f32 %v1620_v56, %v1619_v53  ;;  %v1628_v60 = vrot.slane %v1627_v58, 4  ;;  %v1615_v62 = vpop.f32.mrf.mxu0 }
 0x4aa   :  { %v1622_v43 = vrot.slane %v1621_v59, 2  ;;  %v1629_v63 = vadd.f32 %v1628_v60, %v1627_v58  ;;  %v1917_v0 = vpop.f32.mrf.mxu0 }
 0x4ac   :  { %v1623_v1 = vadd.f32 %v1622_v43, %v1621_v59  ;;  %v1630_v2 = vrot.slane %v1629_v63, 2 }
 0x4ae   :  { %v1624_v3 = vrot.slane %v1623_v1, 1  ;;  %v1631_v4 = vadd.f32 %v1630_v2, %v1629_v63 }
 0x4b0   :  { %v1625_v5 = vadd.f32 %v1624_v3, %v1623_v1  ;;  %v1632_v7 = vrot.slane %v1631_v4, 1 }
 0x4b2   :  { %v1633_v8 = vadd.f32 %v1632_v7, %v1631_v4  ;;  %v1634_v9 = vmul.f32 0.5, %v1625_v5 }
 0x4b4   :  { %v1635_v10 = vmul.f32 0.5, %v1633_v8  ;;  %v1636_v49 = vmul.f32 %v1634_v9, %v1634_v9 }
 0x4b6   :  { %v1637_v55 = vsub.f32 %v1635_v10, %v1636_v49 }
 0x4b8   :  { %v1638_v11 = vmax.f32 %v1637_v55, 0.0 }
 0x4ba   :  { %v1641_v61 = vadd.f32 1e-05, %v1638_v11 }
 0x4bc   :  { %2174 = vrsqrt.f32 %v1641_v61 }
 0x4c9   :  { %v2175_v13 = vpop.eup %2174 }
 0x4ca   :  { %v1643_v15 = vmul.f32 %v2175_v13, %v1639_v12 }
 0x4cc   :  { %v1644_v17 = vmul.f32 %v1643_v15, %v1634_v9  ;;  %v1649_v18 = vrot.slane %v1643_v15, %v2356_v47 }
 0x4ce   :  { %v1645_v19 = vsub.f32 %v1640_v16, %v1644_v17  ;;  %v1650_v20 = vmul.f32 %v1649_v18, %v1612_v52 }
 0x4d0   :  { %v1654_v21 = vrot.slane %v1645_v19, %v2356_v47 }
 0x4d2   :  { %v1655_v22 = vadd.f32 %v1654_v21, %v1650_v20 }
 0x4d4   :  { %v1656_v23 = vsub.f32 0.0, %v1655_v22 }
 0x4d6   :  { %v1657_v24 = vmul.f32 1.442695, %v1656_v23 }
 0x4d8   :  { %2176 = vpow2.f32 %v1657_v24 }
 0x4e5   :  { %v2177_v25 = vpop.eup %2176 }
 0x4e6   :  { %v1659_v14 = vadd.f32 1.0, %v2177_v25 }
 0x4e8   :  { %2178 = vrcp.f32 %v1659_v14 }
 0x4f5   :  { %v2179_v26 = vpop.eup %2178 }
 0x4f6   :  { %1661 = vst.msk [vmem:[#allocation5] sm:$0x3] %vm1618_vm2, %v2179_v26 }
 0x4f7   :  { %2211 = shalt.err (!%p2208_p9)
}
 0x4f8   :  { %1671 = dma.vmem_to_hbm [thread:$0]  %s1669_s3, 32, %s2474_s6, [#allocation4]  }
 0x4f9   :  { %2222 = dma.done.wait [#allocation4], 32  }
 0x4fa   :  { %2223 = vsyncadd [#allocation4], 4294967264 }
 0x4fb   :  { %1675 = vsyncpa [#allocation3], 1 }
 0x4fc   :  { %1676 = vsyncpa [#allocation4], 1 }

</bundles_post_ra>
